<compile_context>
chip_gen: v5e
topology: v5e:2x2
jax: 0.10.0
libtpu: 0.0.40
codegen_flags: <defaults>
</compile_context>

<pallas_src>
import math

import jax
import jax.numpy as jnp
import numpy as np
from jax import lax
from jax.experimental import pallas as pl
from jax.experimental.pallas import tpu as pltpu

IMAGE_SIZE = (3, 3)   # the only image_size for which the PyTorch forward runs
_NY, _NX = IMAGE_SIZE
_LANES = 128          # lane-dense output row width (results live in lanes 0.._NX-1)

# Packed-parameter layout: 8 groups x 3 rows = 24 float32 scalars per Gabor set.
_COS, _SIN, _AX, _AY, _WL, _PSI, _C0, _C1 = (3 * i for i in range(8))
_NPARAMS = 24


def _gabor_kernel(p_ref, out_ref):
    """One grid step = one Gabor parameter set.

    p_ref   : (B, 24) float32 in SMEM (whole packed parameter table).
    out_ref : (3, 128) float32 VMEM block for this batch element.
    """
    b = pl.program_id(0)

    # Column coordinate plane + the two column-broadcast center planes, built
    # once per grid step.  Only lanes 0.._NX-1 are meaningful; the remaining
    # lanes hold harmless finite filler that the wrapper slices away.
    coli = lax.broadcasted_iota(jnp.int32, (1, _LANES), 1)
    xg = coli.astype(jnp.float32) * (2.0 / (_NX - 1)) - 1.0   # linspace(-1,1,nx) on lanes
    c0c = jnp.where(coli == 0, p_ref[b, _C0],
          jnp.where(coli == 1, p_ref[b, _C0 + 1], p_ref[b, _C0 + 2]))
    c1c = jnp.where(coli == 0, p_ref[b, _C1],
          jnp.where(coli == 1, p_ref[b, _C1 + 1], p_ref[b, _C1 + 2]))

    rows = []
    for r in range(_NY):                        # statically unrolled (3 rows)
        yg = -1.0 + r * (2.0 / (_NY - 1))       # linspace(-1,1,ny)[r], python const
        cos_t = p_ref[b, _COS + r]              # SMEM scalar -> vreg broadcast
        sin_t = p_ref[b, _SIN + r]
        ax = p_ref[b, _AX + r]                  # -0.5 / sigma_x**2
        ay = p_ref[b, _AY + r]                  # -0.5 / sigma_y**2
        wl = p_ref[b, _WL + r]                  # 2*pi / Lambda
        psi = p_ref[b, _PSI + r]
        c0r = p_ref[b, _C0 + r]                 # center[:, 0].unsqueeze(-1) (row bcast)
        c1r = p_ref[b, _C1 + r]                 # center[:, 1].unsqueeze(-1) (row bcast)

        # Same (asymmetric) broadcasting as the PyTorch reference, verbatim:
        # x_theta uses row-broadcast centers, y_theta the column-broadcast ones.
        x_theta = (xg - c0r) * cos_t + (yg - c1r) * sin_t        # (1, 128)
        y_theta = -(xg - c0c) * sin_t + (yg - c1c) * cos_t       # (1, 128)
        envelope = jnp.exp(ax * x_theta * x_theta + ay * y_theta * y_theta)
        carrier = jnp.cos(wl * x_theta + psi)
        rows.append(envelope * carrier)

    out_ref[...] = jnp.concatenate(rows, axis=0)   # single lane-dense (3, 128) store


def _pack_params(theta, sigma, Lambda, psi, gamma, center):
    """Pack one or B Gabor parameter sets into a (B, 24) float32 table.

    Accepts the module's parameter shapes ((3,1)/(3,2)) or batched versions
    ((B,3,1)/(B,3,2)).  All per-Gabor scalar math (trig of theta, -0.5/sigma^2,
    2*pi/Lambda) is hoisted here so the kernel body has no per-element divides.
    """
    theta = jnp.asarray(theta, jnp.float32)
    sigma = jnp.asarray(sigma, jnp.float32)
    lam = jnp.asarray(Lambda, jnp.float32)
    psi = jnp.asarray(psi, jnp.float32)
    gamma = jnp.asarray(gamma, jnp.float32)
    center = jnp.asarray(center, jnp.float32)

    if theta.ndim == 2:  # single parameter set -> add batch dim
        theta, sigma, lam, psi, gamma = (a[None] for a in (theta, sigma, lam, psi, gamma))
        center = center[None]

    B = theta.shape[0]
    th = theta.reshape(B, 3)
    sg = sigma.reshape(B, 3)
    lm = lam.reshape(B, 3)
    ps = psi.reshape(B, 3)
    gm = gamma.reshape(B, 3)
    c0 = center.reshape(B, 3, 2)[:, :, 0]
    c1 = center.reshape(B, 3, 2)[:, :, 1]

    cos_t = jnp.cos(th)
    sin_t = jnp.sin(th)
    inv_s2 = 1.0 / (sg * sg)
    ax = -0.5 * inv_s2                       # sigma_x = sigma
    ay = -0.5 * (gm * gm) * inv_s2           # sigma_y = sigma / gamma
    wl = (2.0 * math.pi) / lm

    params = jnp.concatenate([cos_t, sin_t, ax, ay, wl, ps, c0, c1], axis=1)
    assert params.shape == (B, _NPARAMS)
    return params


def _gabor_pallas(params):
    """params: (B, 24) float32 packed table -> (B, 3, 3) float32 Gabor maps."""
    B = params.shape[0]
    out = pl.pallas_call(
        _gabor_kernel,
        grid=(B,),
        in_specs=[pl.BlockSpec(memory_space=pltpu.MemorySpace.SMEM)],
        out_specs=pl.BlockSpec((None, _NY, _LANES), lambda b: (b, 0, 0)),
        out_shape=jax.ShapeDtypeStruct((B, _NY, _LANES), jnp.float32),
        compiler_params=pltpu.CompilerParams(dimension_semantics=("parallel",)),
    )(params)
    return out[:, :, :_NX]


def gabor_forward(theta, sigma, Lambda, psi, gamma, center, image_size=IMAGE_SIZE):
    """GaborGenerator.forward() for a single parameter set -> (1, 1, 3, 3)."""
    ny, nx = image_size
    assert (ny, nx) == (3, 3), \
        "PyTorch reference broadcasting is only shape-consistent for image_size == (3, 3)"
    # TODO(synk): the PyTorch gen_gabor contains host-side print() of shapes; omitted.
    # TODO(synk): for a single 9-element map a fused XLA elementwise op is as fast as
    # any pallas_call; the Pallas kernel pays off in the batched path below.
    gb = _gabor_pallas(_pack_params(theta, sigma, Lambda, psi, gamma, center))
    return gb.reshape(1, 1, ny, nx)


def gabor_forward_batched(theta, sigma, Lambda, psi, gamma, center, image_size=IMAGE_SIZE):
    """Batched forward: (B,3,1)/(B,3,2) parameters -> (B, 1, 1, 3, 3)."""
    ny, nx = image_size
    assert (ny, nx) == (3, 3)
    gb = _gabor_pallas(_pack_params(theta, sigma, Lambda, psi, gamma, center))
    return gb.reshape(-1, 1, 1, ny, nx)


def gabor_forward_ref(theta, sigma, Lambda, psi, gamma, center, image_size=IMAGE_SIZE):
    """Pure-JAX reference mirroring the PyTorch broadcasting exactly."""
    ny, nx = image_size
    ys = jnp.linspace(-1.0, 1.0, ny, dtype=jnp.float32)
    xs = jnp.linspace(-1.0, 1.0, nx, dtype=jnp.float32)
    yg, xg = jnp.meshgrid(ys, xs, indexing="ij")
    x = xg[None]
    y = yg[None]
    sigma_x = sigma
    sigma_y = sigma / gamma
    x_theta = ((x - center[:, 0][:, None]) * jnp.cos(theta)
               + (y - center[:, 1][:, None]) * jnp.sin(theta))
    y_theta = (-(x - center[:, 0]) * jnp.sin(theta)
               + (y - center[:, 1]) * jnp.cos(theta))
    gb = (jnp.exp(-0.5 * (x_theta ** 2 / sigma_x ** 2 + y_theta ** 2 / sigma_y ** 2))
          * jnp.cos(2.0 * jnp.pi / Lambda * x_theta + psi))
    return gb.reshape(1, 1, ny, nx)


if __name__ == "__main__":
    key = jax.random.PRNGKey(0)
    k_theta, k_psi, k_rand = jax.random.split(key, 3)

    # Module-default initialization (GaborGenerator.__init__ shapes/values).
    theta = jax.random.uniform(k_theta, (3, 1), dtype=jnp.float32)   # torch.rand(3,1)
    sigma = 3.0 * jnp.ones((3, 1), jnp.float32)                      # 3*ones(3,1)
    Lambda = 2.0 * jnp.ones((3, 1), jnp.float32)                     # 2*ones(3,1)
    psi = jax.random.uniform(k_psi, (3, 1), dtype=jnp.float32)       # torch.rand(3,1)
    gamma = jnp.ones((3, 1), jnp.float32)                            # ones(3,1)
    center = jnp.zeros((3, 2), jnp.float32)                          # zeros(3,2)

    out = jax.block_until_ready(
        gabor_forward(theta, sigma, Lambda, psi, gamma, center))
    assert out.shape == (1, 1, 3, 3) and out.dtype == jnp.float32
    ref = gabor_forward_ref(theta, sigma, Lambda, psi, gamma, center)
    np.testing.assert_allclose(np.asarray(out), np.asarray(ref), rtol=1e-5, atol=1e-5)

    # Batched check (B parameter sets in ONE pallas_call) with non-trivial
    # parameters/centers so every broadcast path (row vs column, asymmetric
    # center handling) is actually exercised.
    B = 8
    ks = jax.random.split(k_rand, 6)
    theta_b = jax.random.uniform(ks[0], (B, 3, 1), jnp.float32, -1.0, 1.0)
    sigma_b = jax.random.uniform(ks[1], (B, 3, 1), jnp.float32, 0.5, 3.0)
    Lambda_b = jax.random.uniform(ks[2], (B, 3, 1), jnp.float32, 0.5, 3.0)
    psi_b = jax.random.uniform(ks[3], (B, 3, 1), jnp.float32, -1.0, 1.0)
    gamma_b = jax.random.uniform(ks[4], (B, 3, 1), jnp.float32, 0.5, 2.0)
    center_b = jax.random.uniform(ks[5], (B, 3, 2), jnp.float32, -0.5, 0.5)

    out_b = jax.block_until_ready(
        gabor_forward_batched(theta_b, sigma_b, Lambda_b, psi_b, gamma_b, center_b))
    assert out_b.shape == (B, 1, 1, 3, 3)
    ref_b = jnp.stack([
        gabor_forward_ref(theta_b[i], sigma_b[i], Lambda_b[i], psi_b[i],
                          gamma_b[i], center_b[i]) for i in range(B)])
    np.testing.assert_allclose(np.asarray(out_b), np.asarray(ref_b), rtol=1e-5, atol=1e-5)

    print("KERNEL_OK")
</pallas_src>

<mosaic_0001>
module attributes {stable_mosaic.version = 11 : i64} {
  func.func @_gabor_kernel(%arg0: i32, %arg1: memref<1x24xf32, #tpu.memory_space<smem>>, %arg2: memref<1x3x128xf32, #tpu.memory_space<vmem>>) attributes {dimension_semantics = [#tpu.dimension_semantics<parallel>], iteration_bounds = array<i64: 1>, scalar_prefetch = 0 : i64, scratch_operands = 0 : i64, tpu.core_type = #tpu.core_type<tc>, window_params = [{transform_indices = @transform_0, window_bounds = array<i64: 1, 24>}, {transform_indices = @transform_1, window_bounds = array<i64: 1, 3, 128>}]} {
    %0 = tpu.iota {dimensions = array<i32: 1>} : vector<1x128xi32>
    %1 = arith.sitofp %0 : vector<1x128xi32> to vector<1x128xf32>
    %cst = arith.constant 1.000000e+00 : f32
    %2 = vector.broadcast %cst : f32 to vector<1x128xf32>
    %3 = arith.mulf %1, %2 : vector<1x128xf32>
    %cst_0 = arith.constant 1.000000e+00 : f32
    %4 = vector.broadcast %cst_0 : f32 to vector<1x128xf32>
    %5 = arith.subf %3, %4 : vector<1x128xf32>
    %c0_i32 = arith.constant 0 : i32
    %6 = vector.broadcast %c0_i32 : i32 to vector<1x128xi32>
    %7 = arith.cmpi eq, %0, %6 : vector<1x128xi32>
    %8 = arith.index_cast %arg0 : i32 to index
    %c18 = arith.constant 18 : index
    %9 = memref.load %arg1[%8, %c18] : memref<1x24xf32, #tpu.memory_space<smem>>
    %c1_i32 = arith.constant 1 : i32
    %10 = vector.broadcast %c1_i32 : i32 to vector<1x128xi32>
    %11 = arith.cmpi eq, %0, %10 : vector<1x128xi32>
    %12 = arith.index_cast %arg0 : i32 to index
    %c19 = arith.constant 19 : index
    %13 = memref.load %arg1[%12, %c19] : memref<1x24xf32, #tpu.memory_space<smem>>
    %14 = arith.index_cast %arg0 : i32 to index
    %c20 = arith.constant 20 : index
    %15 = memref.load %arg1[%14, %c20] : memref<1x24xf32, #tpu.memory_space<smem>>
    %16 = vector.broadcast %13 : f32 to vector<1x128xf32>
    %17 = vector.broadcast %15 : f32 to vector<1x128xf32>
    %18 = arith.select %11, %16, %17 : vector<1x128xi1>, vector<1x128xf32>
    %19 = vector.broadcast %9 : f32 to vector<1x128xf32>
    %20 = arith.select %7, %19, %18 : vector<1x128xi1>, vector<1x128xf32>
    %c0_i32_1 = arith.constant 0 : i32
    %21 = vector.broadcast %c0_i32_1 : i32 to vector<1x128xi32>
    %22 = arith.cmpi eq, %0, %21 : vector<1x128xi32>
    %23 = arith.index_cast %arg0 : i32 to index
    %c21 = arith.constant 21 : index
    %24 = memref.load %arg1[%23, %c21] : memref<1x24xf32, #tpu.memory_space<smem>>
    %c1_i32_2 = arith.constant 1 : i32
    %25 = vector.broadcast %c1_i32_2 : i32 to vector<1x128xi32>
    %26 = arith.cmpi eq, %0, %25 : vector<1x128xi32>
    %27 = arith.index_cast %arg0 : i32 to index
    %c22 = arith.constant 22 : index
    %28 = memref.load %arg1[%27, %c22] : memref<1x24xf32, #tpu.memory_space<smem>>
    %29 = arith.index_cast %arg0 : i32 to index
    %c23 = arith.constant 23 : index
    %30 = memref.load %arg1[%29, %c23] : memref<1x24xf32, #tpu.memory_space<smem>>
    %31 = vector.broadcast %28 : f32 to vector<1x128xf32>
    %32 = vector.broadcast %30 : f32 to vector<1x128xf32>
    %33 = arith.select %26, %31, %32 : vector<1x128xi1>, vector<1x128xf32>
    %34 = vector.broadcast %24 : f32 to vector<1x128xf32>
    %35 = arith.select %22, %34, %33 : vector<1x128xi1>, vector<1x128xf32>
    %36 = arith.index_cast %arg0 : i32 to index
    %c0 = arith.constant 0 : index
    %37 = memref.load %arg1[%36, %c0] : memref<1x24xf32, #tpu.memory_space<smem>>
    %38 = arith.index_cast %arg0 : i32 to index
    %c3 = arith.constant 3 : index
    %39 = memref.load %arg1[%38, %c3] : memref<1x24xf32, #tpu.memory_space<smem>>
    %40 = arith.index_cast %arg0 : i32 to index
    %c6 = arith.constant 6 : index
    %41 = memref.load %arg1[%40, %c6] : memref<1x24xf32, #tpu.memory_space<smem>>
    %42 = arith.index_cast %arg0 : i32 to index
    %c9 = arith.constant 9 : index
    %43 = memref.load %arg1[%42, %c9] : memref<1x24xf32, #tpu.memory_space<smem>>
    %44 = arith.index_cast %arg0 : i32 to index
    %c12 = arith.constant 12 : index
    %45 = memref.load %arg1[%44, %c12] : memref<1x24xf32, #tpu.memory_space<smem>>
    %46 = arith.index_cast %arg0 : i32 to index
    %c15 = arith.constant 15 : index
    %47 = memref.load %arg1[%46, %c15] : memref<1x24xf32, #tpu.memory_space<smem>>
    %48 = arith.index_cast %arg0 : i32 to index
    %c18_3 = arith.constant 18 : index
    %49 = memref.load %arg1[%48, %c18_3] : memref<1x24xf32, #tpu.memory_space<smem>>
    %50 = arith.index_cast %arg0 : i32 to index
    %c21_4 = arith.constant 21 : index
    %51 = memref.load %arg1[%50, %c21_4] : memref<1x24xf32, #tpu.memory_space<smem>>
    %52 = vector.broadcast %49 : f32 to vector<1x128xf32>
    %53 = arith.subf %5, %52 : vector<1x128xf32>
    %54 = vector.broadcast %37 : f32 to vector<1x128xf32>
    %55 = arith.mulf %53, %54 : vector<1x128xf32>
    %cst_5 = arith.constant -1.000000e+00 : f32
    %56 = arith.subf %cst_5, %51 : f32
    %57 = arith.mulf %56, %39 : f32
    %58 = vector.broadcast %57 : f32 to vector<1x128xf32>
    %59 = arith.addf %55, %58 : vector<1x128xf32>
    %60 = arith.subf %5, %20 : vector<1x128xf32>
    %cst_6 = arith.constant 0.000000e+00 : f32
    %61 = vector.broadcast %cst_6 : f32 to vector<1x128xf32>
    %62 = arith.subf %61, %60 : vector<1x128xf32>
    %63 = vector.broadcast %39 : f32 to vector<1x128xf32>
    %64 = arith.mulf %62, %63 : vector<1x128xf32>
    %cst_7 = arith.constant -1.000000e+00 : f32
    %65 = vector.broadcast %cst_7 : f32 to vector<1x128xf32>
    %66 = arith.subf %65, %35 : vector<1x128xf32>
    %67 = vector.broadcast %37 : f32 to vector<1x128xf32>
    %68 = arith.mulf %66, %67 : vector<1x128xf32>
    %69 = arith.addf %64, %68 : vector<1x128xf32>
    %70 = vector.broadcast %41 : f32 to vector<1x128xf32>
    %71 = arith.mulf %70, %59 : vector<1x128xf32>
    %72 = arith.mulf %71, %59 : vector<1x128xf32>
    %73 = vector.broadcast %43 : f32 to vector<1x128xf32>
    %74 = arith.mulf %73, %69 : vector<1x128xf32>
    %75 = arith.mulf %74, %69 : vector<1x128xf32>
    %76 = arith.addf %72, %75 : vector<1x128xf32>
    %77 = math.exp %76 : vector<1x128xf32>
    %78 = vector.broadcast %45 : f32 to vector<1x128xf32>
    %79 = arith.mulf %78, %59 : vector<1x128xf32>
    %80 = vector.broadcast %47 : f32 to vector<1x128xf32>
    %81 = arith.addf %79, %80 : vector<1x128xf32>
    %82 = math.cos %81 : vector<1x128xf32>
    %83 = arith.mulf %77, %82 : vector<1x128xf32>
    %84 = arith.index_cast %arg0 : i32 to index
    %c1 = arith.constant 1 : index
    %85 = memref.load %arg1[%84, %c1] : memref<1x24xf32, #tpu.memory_space<smem>>
    %86 = arith.index_cast %arg0 : i32 to index
    %c4 = arith.constant 4 : index
    %87 = memref.load %arg1[%86, %c4] : memref<1x24xf32, #tpu.memory_space<smem>>
    %88 = arith.index_cast %arg0 : i32 to index
    %c7 = arith.constant 7 : index
    %89 = memref.load %arg1[%88, %c7] : memref<1x24xf32, #tpu.memory_space<smem>>
    %90 = arith.index_cast %arg0 : i32 to index
    %c10 = arith.constant 10 : index
    %91 = memref.load %arg1[%90, %c10] : memref<1x24xf32, #tpu.memory_space<smem>>
    %92 = arith.index_cast %arg0 : i32 to index
    %c13 = arith.constant 13 : index
    %93 = memref.load %arg1[%92, %c13] : memref<1x24xf32, #tpu.memory_space<smem>>
    %94 = arith.index_cast %arg0 : i32 to index
    %c16 = arith.constant 16 : index
    %95 = memref.load %arg1[%94, %c16] : memref<1x24xf32, #tpu.memory_space<smem>>
    %96 = arith.index_cast %arg0 : i32 to index
    %c19_8 = arith.constant 19 : index
    %97 = memref.load %arg1[%96, %c19_8] : memref<1x24xf32, #tpu.memory_space<smem>>
    %98 = arith.index_cast %arg0 : i32 to index
    %c22_9 = arith.constant 22 : index
    %99 = memref.load %arg1[%98, %c22_9] : memref<1x24xf32, #tpu.memory_space<smem>>
    %100 = vector.broadcast %97 : f32 to vector<1x128xf32>
    %101 = arith.subf %5, %100 : vector<1x128xf32>
    %102 = vector.broadcast %85 : f32 to vector<1x128xf32>
    %103 = arith.mulf %101, %102 : vector<1x128xf32>
    %cst_10 = arith.constant 0.000000e+00 : f32
    %104 = arith.subf %cst_10, %99 : f32
    %105 = arith.mulf %104, %87 : f32
    %106 = vector.broadcast %105 : f32 to vector<1x128xf32>
    %107 = arith.addf %103, %106 : vector<1x128xf32>
    %108 = arith.subf %5, %20 : vector<1x128xf32>
    %cst_11 = arith.constant 0.000000e+00 : f32
    %109 = vector.broadcast %cst_11 : f32 to vector<1x128xf32>
    %110 = arith.subf %109, %108 : vector<1x128xf32>
    %111 = vector.broadcast %87 : f32 to vector<1x128xf32>
    %112 = arith.mulf %110, %111 : vector<1x128xf32>
    %cst_12 = arith.constant 0.000000e+00 : f32
    %113 = vector.broadcast %cst_12 : f32 to vector<1x128xf32>
    %114 = arith.subf %113, %35 : vector<1x128xf32>
    %115 = vector.broadcast %85 : f32 to vector<1x128xf32>
    %116 = arith.mulf %114, %115 : vector<1x128xf32>
    %117 = arith.addf %112, %116 : vector<1x128xf32>
    %118 = vector.broadcast %89 : f32 to vector<1x128xf32>
    %119 = arith.mulf %118, %107 : vector<1x128xf32>
    %120 = arith.mulf %119, %107 : vector<1x128xf32>
    %121 = vector.broadcast %91 : f32 to vector<1x128xf32>
    %122 = arith.mulf %121, %117 : vector<1x128xf32>
    %123 = arith.mulf %122, %117 : vector<1x128xf32>
    %124 = arith.addf %120, %123 : vector<1x128xf32>
    %125 = math.exp %124 : vector<1x128xf32>
    %126 = vector.broadcast %93 : f32 to vector<1x128xf32>
    %127 = arith.mulf %126, %107 : vector<1x128xf32>
    %128 = vector.broadcast %95 : f32 to vector<1x128xf32>
    %129 = arith.addf %127, %128 : vector<1x128xf32>
    %130 = math.cos %129 : vector<1x128xf32>
    %131 = arith.mulf %125, %130 : vector<1x128xf32>
    %132 = arith.index_cast %arg0 : i32 to index
    %c2 = arith.constant 2 : index
    %133 = memref.load %arg1[%132, %c2] : memref<1x24xf32, #tpu.memory_space<smem>>
    %134 = arith.index_cast %arg0 : i32 to index
    %c5 = arith.constant 5 : index
    %135 = memref.load %arg1[%134, %c5] : memref<1x24xf32, #tpu.memory_space<smem>>
    %136 = arith.index_cast %arg0 : i32 to index
    %c8 = arith.constant 8 : index
    %137 = memref.load %arg1[%136, %c8] : memref<1x24xf32, #tpu.memory_space<smem>>
    %138 = arith.index_cast %arg0 : i32 to index
    %c11 = arith.constant 11 : index
    %139 = memref.load %arg1[%138, %c11] : memref<1x24xf32, #tpu.memory_space<smem>>
    %140 = arith.index_cast %arg0 : i32 to index
    %c14 = arith.constant 14 : index
    %141 = memref.load %arg1[%140, %c14] : memref<1x24xf32, #tpu.memory_space<smem>>
    %142 = arith.index_cast %arg0 : i32 to index
    %c17 = arith.constant 17 : index
    %143 = memref.load %arg1[%142, %c17] : memref<1x24xf32, #tpu.memory_space<smem>>
    %144 = arith.index_cast %arg0 : i32 to index
    %c20_13 = arith.constant 20 : index
    %145 = memref.load %arg1[%144, %c20_13] : memref<1x24xf32, #tpu.memory_space<smem>>
    %146 = arith.index_cast %arg0 : i32 to index
    %c23_14 = arith.constant 23 : index
    %147 = memref.load %arg1[%146, %c23_14] : memref<1x24xf32, #tpu.memory_space<smem>>
    %148 = vector.broadcast %145 : f32 to vector<1x128xf32>
    %149 = arith.subf %5, %148 : vector<1x128xf32>
    %150 = vector.broadcast %133 : f32 to vector<1x128xf32>
    %151 = arith.mulf %149, %150 : vector<1x128xf32>
    %cst_15 = arith.constant 1.000000e+00 : f32
    %152 = arith.subf %cst_15, %147 : f32
    %153 = arith.mulf %152, %135 : f32
    %154 = vector.broadcast %153 : f32 to vector<1x128xf32>
    %155 = arith.addf %151, %154 : vector<1x128xf32>
    %156 = arith.subf %5, %20 : vector<1x128xf32>
    %cst_16 = arith.constant 0.000000e+00 : f32
    %157 = vector.broadcast %cst_16 : f32 to vector<1x128xf32>
    %158 = arith.subf %157, %156 : vector<1x128xf32>
    %159 = vector.broadcast %135 : f32 to vector<1x128xf32>
    %160 = arith.mulf %158, %159 : vector<1x128xf32>
    %cst_17 = arith.constant 1.000000e+00 : f32
    %161 = vector.broadcast %cst_17 : f32 to vector<1x128xf32>
    %162 = arith.subf %161, %35 : vector<1x128xf32>
    %163 = vector.broadcast %133 : f32 to vector<1x128xf32>
    %164 = arith.mulf %162, %163 : vector<1x128xf32>
    %165 = arith.addf %160, %164 : vector<1x128xf32>
    %166 = vector.broadcast %137 : f32 to vector<1x128xf32>
    %167 = arith.mulf %166, %155 : vector<1x128xf32>
    %168 = arith.mulf %167, %155 : vector<1x128xf32>
    %169 = vector.broadcast %139 : f32 to vector<1x128xf32>
    %170 = arith.mulf %169, %165 : vector<1x128xf32>
    %171 = arith.mulf %170, %165 : vector<1x128xf32>
    %172 = arith.addf %168, %171 : vector<1x128xf32>
    %173 = math.exp %172 : vector<1x128xf32>
    %174 = vector.broadcast %141 : f32 to vector<1x128xf32>
    %175 = arith.mulf %174, %155 : vector<1x128xf32>
    %176 = vector.broadcast %143 : f32 to vector<1x128xf32>
    %177 = arith.addf %175, %176 : vector<1x128xf32>
    %178 = math.cos %177 : vector<1x128xf32>
    %179 = arith.mulf %173, %178 : vector<1x128xf32>
    %180 = tpu.concatenate %83, %131, %179 in 0 : vector<1x128xf32>, vector<1x128xf32>, vector<1x128xf32> -> vector<3x128xf32>
    %c0_18 = arith.constant 0 : index
    %c0_19 = arith.constant 0 : index
    %c0_20 = arith.constant 0 : index
    %181 = vector.load %arg2[%c0_18, %c0_19, %c0_20] : memref<1x3x128xf32, #tpu.memory_space<vmem>>, vector<1x3x128xf32>
    %182 = vector.shape_cast %181 : vector<1x3x128xf32> to vector<3x128xf32>
    %183 = vector.shape_cast %180 : vector<3x128xf32> to vector<1x3x128xf32>
    tpu.vector_store %arg2[%c0_18, %c0_19, %c0_20], %183 {strides = array<i32>} : memref<1x3x128xf32, #tpu.memory_space<vmem>>, vector<1x3x128xf32>,
    return
  }
  func.func @transform_0(%arg0: i32) -> (i32, i32) {
    %c0_i32 = arith.constant 0 : i32
    %c0_i32_0 = arith.constant 0 : i32
    %c0_i32_1 = arith.constant 0 : i32
    return %c0_i32, %c0_i32_0 : i32, i32
  }
  func.func @transform_1(%arg0: i32) -> (i32, i32, i32) {
    %c0_i32 = arith.constant 0 : i32
    %c0_i32_0 = arith.constant 0 : i32
    %c0_i32_1 = arith.constant 0 : i32
    return %arg0, %c0_i32, %c0_i32_0 : i32, i32, i32
  }
}

</mosaic_0001>

<bundles_post_ra>
// kernel: tpu_custom_call.1
= control target key start
LH: loop header
LB: loop body
LE: loop exit
PB: predicated region body
PF: predicated region fallthrough
CT: control target
= control target key end

     0   :  { %6 = vsyncpa [#allocation3], 0  ;;  %s698_s9 = smov [#allocation2]   ;;  %s1119_s0 = inlined_call_operand.hbm [shape: f32[1,24], index: 0, kind: input, shape index: {}]   ;;  %s1120_s1 = inlined_call_operand.vmem [shape: f32[1,3,128], index: 1, kind: output, shape index: {}]  }
   0x1   :  { %s12_s8 = sshll.u32 %s1119_s0, 4  ;;  %s13_s8 = int_to_ptr.hbm [resolvable:$true] %s12_s8 }
   0x2   :  { %15 = dma.hbm_to_smem %s13_s8, 16, %s698_s9, [#allocation3]  }
   0x3   :  { %696 = dma.done.wait [#allocation3], 16  }
   0x4   :  { %697 = vsyncadd [#allocation3], 4294967280 }
   0x5   :  { %20 = sfence }
   0x6   :  { %v21_v0 = vlaneseq  ;;  %s638_s10 = sld [smem:[#allocation2 + $0x12]] }
   0x7   :  { %s719_s11 = sld [smem:[#allocation2 + $0x13]] }
   0x8   :  { %v22_v1 = vand.u32 127, %v21_v0  ;;  %s721_s12 = sld [smem:[#allocation2 + $0x14]] }
   0x9   :  { %s723_s13 = sld [smem:[#allocation2 + $0x15]] }
   0xa   :  { %v23_v2 = vcvt.s32.f32 %v22_v1  ;;  %s725_s14 = sld [smem:[#allocation2 + $0x16]]  ;;  %vm29_vm0 = vcmp.eq.s32.totalorder %v22_v1, 1  ;;  %vm25_vm1 = vcmp.eq.s32.totalorder %v22_v1, 0 }
   0xb   :  { %s727_s0 = sld [smem:[#allocation2 + $0x17]] }
   0xc   :  { %v729_v3 = vadd.f32 -1.0, %v23_v2  ;;  %v37_v4 = vstv %s638_s10  ;;  %s731_s15 = sld [smem:[#allocation2]] }
   0xd   :  { %s644_s16 = sld [smem:[#allocation2 + $0x3]]  ;;  %v34_v5 = vstv %s719_s11 }
   0xe   :  { %v35_v6 = vstv %s721_s12  ;;  %s735_s17 = sld [smem:[#allocation2 + $0x6]]  ;;  %v61_v8 = vsub.f32 %v729_v3, %v37_v4  ;;  %v255_v22 = vsub.f32 %v729_v3, %v34_v5 }
   0xf   :  { %v36_v7 = vsel %vm29_vm0, %v34_v5, %v35_v6  ;;  %s738_s18 = sld [smem:[#allocation2 + $0x9]]  ;;  %v48_v11 = vstv %s723_s13  ;;  %v447_v49 = vsub.f32 %v729_v3, %v35_v6  ;;  %v699_v5 = vmov 683565275  }
  0x10   :  { %v38_v9 = vsel %vm25_vm1, %v37_v4, %v36_v7  ;;  %v45_v10 = vstv %s725_s14  ;;  %s647_s19 = sld [smem:[#allocation2 + $0xc]]  ;;  %v700_v7 = vmov 2475754826  }
  0x11   :  { %v46_v12 = vstv %s727_s0  ;;  %s745_s20 = sld [smem:[#allocation2 + $0xf]]  ;;  %v68_v13 = vsub.f32 %v729_v3, %v38_v9  ;;  %v701_v9 = vmov 2131351028  }
  0x12   :  { %v47_v14 = vsel %vm29_vm0, %v45_v10, %v46_v12  ;;  %v62_v15 = vstv %s731_s15  ;;  %s64_s21 = ssub.f32 -1.0, %s723_s13 }
  0x13   :  { %v752_v16 = vsel %vm25_vm1, %v48_v11, %v47_v14  ;;  %v63_v17 = vmul.f32 %v62_v15, %v61_v8  ;;  %v754_v18 = vsub.f32 0.0, %v68_v13  ;;  %v70_v19 = vstv %s644_s16  ;;  %s756_s22 = sld [smem:[#allocation2 + $0x1]] }
  0x14   :  { %s65_s23 = smul.f32 %s644_s16, %s64_s21  ;;  %v72_v20 = vsub.f32 -1.0, %v752_v16  ;;  %s759_s24 = sld [smem:[#allocation2 + $0x4]]  ;;  %v75_v25 = vstv %s735_s17  ;;  %v702_v11 = vmov 2102212464   ;;  %v703_v13 = vmov 920167782  }
  0x15   :  { %v71_v21 = vmul.f32 %v70_v19, %v754_v18  ;;  %v78_v28 = vstv %s738_s18  ;;  %s656_s25 = sld [smem:[#allocation2 + $0xd]] }
  0x16   :  { %v66_v23 = vstv %s65_s23  ;;  %v73_v24 = vmul.f32 %v72_v20, %v62_v15  ;;  %v84_v26 = vstv %s647_s19  ;;  %s766_s26 = sld [smem:[#allocation2 + $0x10]] }
  0x17   :  { %v67_v27 = vadd.f32 %v66_v23, %v63_v17  ;;  %v86_v30 = vstv %s745_s20  ;;  %s258_s27 = ssub.f32 0.0, %s725_s14 }
  0x18   :  { %v74_v29 = vadd.f32 %v73_v24, %v71_v21  ;;  %s772_s28 = sld [smem:[#allocation2 + $0x2]]  ;;  %v704_v24 = vmov 1326507024  }
  0x19   :  { %v76_v31 = vmul.f32 %v75_v25, %v67_v27  ;;  %v85_v32 = vmul.f32 %v84_v26, %v67_v27  ;;  %v256_v33 = vstv %s756_s22  ;;  %s777_s30 = sld [smem:[#allocation2 + $0x5]] }
  0x1a   :  { %v79_v34 = vmul.f32 %v78_v28, %v74_v29  ;;  %v257_v35 = vmul.f32 %v256_v33, %v255_v22  ;;  %s259_s29 = smul.f32 %s759_s24, %s258_s27  ;;  %s450_s2 = ssub.f32 1.0, %s727_s0 }
  0x1b   :  { %v77_v36 = vmul.f32 %v76_v31, %v67_v27  ;;  %v774_v37 = vadd.f32 %v86_v30, %v85_v32  ;;  %v276_v44 = vstv %s656_s25  ;;  %s790_s3 = sld [smem:[#allocation2 + $0xe]] }
  0x1c   :  { %v80_v38 = vmul.f32 %v79_v34, %v74_v29  ;;  %v260_v41 = vstv %s259_s29  ;;  %v278_v47 = vstv %s766_s26  ;;  %s823_s5 = sld [smem:[#allocation2 + $0x11]] }
  0x1d   :  { %v88_v39 = vand.u32 2147483647, %v774_v37  ;;  %v91_v40 = vand.u32 2139095040, %v774_v37  ;;  %v783_v43 = vadd.f32 %v260_v41, %v257_v35  ;;  %s907_s6 = sld [smem:[#allocation2 + $0x7]] }
  0x1e   :  { %v781_v42 = vadd.f32 %v80_v38, %v77_v36  ;;  %v448_v52 = vstv %s772_s28  ;;  %s912_s7 = sld [smem:[#allocation2 + $0xa]] }
  0x1f   :  { %v92_v45 = vshrl.u32 %v91_v40, 23  ;;  %v95_v46 = vand.u32 8388607, %v88_v39  ;;  %v277_v48 = vmul.f32 %v276_v44, %v783_v43  ;;  %s451_s4 = smul.f32 %s777_s30, %s450_s2  ;;  %v449_v57 = vmul.f32 %v448_v52, %v447_v49  ;;  %s663_s8 = sld [smem:[#allocation2 + $0x8]] }
  0x20   :  { %s664_s9 = sld [smem:[#allocation2 + $0xb]] }
  0x21   :  { %v649_v50 = vadd.s32 4294967169, %v92_v45  ;;  %v96_v51 = vor.u32 8388608, %v95_v46  ;;  %v795_v53 = vadd.f32 %v278_v47, %v277_v48  ;;  %v452_v58 = vstv %s451_s4 }
  0x22   :  { %v806_v2 = vadd.f32 %v452_v58, %v449_v57  ;;  %v468_v3 = vstv %s790_s3 }
  0x23   :  { %v98_v54 = vadd.s32 1, %v649_v50  ;;  %v797_v55 = vshll.u32 %v96_v51, 8  ;;  %v283_v56 = vand.u32 2139095040, %v795_v53  ;;  %v280_v60 = vand.u32 2147483647, %v795_v53 }
  0x25   :  { %vm99_vm2 = vcmp.gt.s32.totalorder %v98_v54, 0  ;;  %v284_v61 = vshrl.u32 %v283_v56, 23  ;;  %v804_v0 = vand.u32 65535, %v797_v55  ;;  %v138_v15 = vshrl.u32 %v797_v55, 16 }
  0x26   :  { %v100_v59 = vsel %vm99_vm2, %v98_v54, 0  ;;  %v287_v17 = vand.u32 8388607, %v280_v60 }
  0x27   :  { %v101_v62 = vshrl.u32 %v100_v59, 5  ;;  %v102_v63 = vand.u32 31, %v100_v59  ;;  %v658_v1 = vadd.s32 4294967169, %v284_v61  ;;  %v841_v61 = vmul.f32 %v468_v3, %v806_v2 }
  0x28   :  { %v288_v32 = vor.u32 8388608, %v287_v17 }
  0x29   :  { %v103_v4 = vsub.s32 32, %v102_v63  ;;  %v105_v6 = vshll.u32 %v699_v5, %v102_v63  ;;  %v108_v8 = vshll.u32 %v700_v7, %v102_v63  ;;  %v111_v10 = vshll.u32 %v701_v9, %v102_v63 }
  0x2a   :  { %v114_v12 = vshll.u32 %v702_v11, %v102_v63  ;;  %v117_v14 = vshll.u32 %v703_v13, %v102_v63  ;;  %vm120_vm3 = vcmp.lt.s32.totalorder %v101_v62, 1  ;;  %vm123_vm4 = vcmp.lt.s32.totalorder %v101_v62, 4 }
  0x2b   :  { %v106_v19 = vshrl.u32 %v700_v7, %v103_v4  ;;  %v109_v20 = vshrl.u32 %v701_v9, %v103_v4  ;;  %v112_v21 = vshrl.u32 %v702_v11, %v103_v4  ;;  %v104_v22 = vshrl.u32 %v699_v5, %v103_v4 }
  0x2c   :  { %v115_v23 = vshrl.u32 %v703_v13, %v103_v4  ;;  %v118_v25 = vshrl.u32 %v704_v24, %v103_v4  ;;  %v290_v29 = vadd.s32 1, %v658_v1  ;;  %vm122_vm5 = vcmp.lt.s32.totalorder %v101_v62, 3 }
  0x2d   :  { %v107_v26 = vor.u32 %v106_v19, %v105_v6  ;;  %v110_v27 = vor.u32 %v109_v20, %v108_v8  ;;  %v113_v28 = vor.u32 %v112_v21, %v111_v10  ;;  %vm121_vm6 = vcmp.lt.s32.totalorder %v101_v62, 2 }
  0x2e   :  { %v116_v30 = vor.u32 %v115_v23, %v114_v12  ;;  %v119_v31 = vor.u32 %v118_v25, %v117_v14  ;;  %vm291_vm7 = vcmp.gt.s32.totalorder %v290_v29, 0  ;;  %v838_v59 = vshll.u32 %v288_v32, 8 }
  0x2f   :  { %v125_v34 = vsel %vm123_vm4, %v113_v28, 2102212464  ;;  %v128_v35 = vsel %vm120_vm3, %v107_v26, %v110_v27  ;;  %v132_v36 = vsel %vm120_vm3, %v110_v27, %v113_v28  ;;  %v124_v38 = vsel %vm120_vm3, %v104_v22, %v107_v26 }
  0x30   :  { %v129_v40 = vsel %vm123_vm4, %v116_v30, 920167782  ;;  %v133_v41 = vsel %vm123_vm4, %v119_v31, 1326507024  ;;  %v126_v44 = vsel %vm122_vm5, %v110_v27, %v125_v34  ;;  %v292_v47 = vsel %vm291_vm7, %v290_v29, 0 }
  0x31   :  { %v130_v45 = vsel %vm122_vm5, %v113_v28, %v129_v40  ;;  %v134_v46 = vsel %vm122_vm5, %v116_v30, %v133_v41  ;;  %v833_v50 = vshrl.u32 %v292_v47, 5  ;;  %v836_v58 = vsel %vm121_vm6, %v124_v38, %v126_v44 }
  0x32   :  { %v131_v48 = vsel %vm121_vm6, %v128_v35, %v130_v45  ;;  %v135_v49 = vsel %vm121_vm6, %v132_v36, %v134_v46  ;;  %v470_v63 = vstv %s823_s5  ;;  %v294_v8 = vand.u32 31, %v292_v47 }
  0x33   :  { %v139_v51 = vand.u32 65535, %v135_v49  ;;  %v140_v54 = vshrl.u32 %v135_v49, 16  ;;  %v161_v56 = vand.u32 65535, %v131_v48  ;;  %v162_v57 = vshrl.u32 %v131_v48, 16 }
  0x34   :  { %vm312_vm8 = vcmp.lt.s32.totalorder %v833_v50, 1  ;;  %v295_v28 = vsub.s32 32, %v294_v8  ;;  %v705_v29 = vmov 0   ;;  %v297_v31 = vshll.u32 %v699_v5, %v294_v8 }
  0x35   :  { %v141_v1 = vmul.u32 %v139_v51, %v804_v0  ;;  %v142_v4 = vmul.u32 %v140_v54, %v804_v0  ;;  %v143_v6 = vmul.u32 %v139_v51, %v138_v15  ;;  %v144_v10 = vmul.u32 %v140_v54, %v138_v15 }
  0x36   :  { %v163_v12 = vmul.u32 %v161_v56, %v804_v0  ;;  %v164_v14 = vmul.u32 %v162_v57, %v804_v0  ;;  %v165_v62 = vmul.u32 %v161_v56, %v138_v15  ;;  %v166_v21 = vmul.u32 %v162_v57, %v138_v15 }
  0x37   :  { %v145_v17 = vshll.u32 %v142_v4, 16  ;;  %v146_v19 = vshrl.u32 %v142_v4, 16  ;;  %v147_v20 = vshll.u32 %v143_v6, 16  ;;  %v148_v3 = vshrl.u32 %v143_v6, 16 }
  0x38   :  { %v167_v22 = vshll.u32 %v164_v14, 16  ;;  %v168_v23 = vshrl.u32 %v164_v14, 16  ;;  %v169_v25 = vshll.u32 %v165_v62, 16  ;;  %v170_v27 = vshrl.u32 %v165_v62, 16 }
  0x39   :  { %vm149_vm9 = vc.u32 %v141_v1, %v145_v17  ;;  %v151_v26 = vadd.s32 %v145_v17, %v141_v1  ;;  %v300_v34 = vshll.u32 %v700_v7, %v294_v8  ;;  %v298_v44 = vshrl.u32 %v700_v7, %v295_v28 }
  0x3a   :  { %v150_v30 = vsel %vm149_vm9, 1, %v705_v29  ;;  %vm171_vm10 = vc.u32 %v163_v12, %v167_v22  ;;  %v173_v0 = vadd.s32 %v167_v22, %v163_v12  ;;  %v301_v45 = vshrl.u32 %v701_v9, %v295_v28 }
  0x3b   :  { %v152_v32 = vadd.s32 %v150_v30, %v144_v10  ;;  %vm153_vm11 = vc.u32 %v151_v26, %v147_v20  ;;  %v172_v15 = vsel %vm171_vm10, 1, %v705_v29  ;;  %v303_v47 = vshll.u32 %v701_v9, %v294_v8 }
  0x3c   :  { %v154_v35 = vsel %vm153_vm11, 1, %v705_v29  ;;  %v174_v36 = vadd.s32 %v172_v15, %v166_v21  ;;  %vm175_vm12 = vc.u32 %v173_v0, %v169_v25  ;;  %v854_v38 = vadd.s32 %v173_v0, %v169_v25 }
  0x3d   :  { %v156_v40 = vadd.s32 %v154_v35, %v152_v32  ;;  %v176_v41 = vsel %vm175_vm12, 1, %v705_v29  ;;  %v304_v48 = vshrl.u32 %v702_v11, %v295_v28  ;;  %v306_v49 = vshll.u32 %v702_v11, %v294_v8 }
  0x3e   :  { %v178_v46 = vadd.s32 %v176_v41, %v174_v36  ;;  %v299_v54 = vor.u32 %v298_v44, %v297_v31  ;;  %v302_v56 = vor.u32 %v301_v45, %v300_v34  ;;  %v307_v57 = vshrl.u32 %v703_v13, %v295_v28 }
  0x3f   :  { %v157_v51 = vadd.s32 %v156_v40, %v146_v19  ;;  %v305_v4 = vor.u32 %v304_v48, %v303_v47  ;;  %v309_v6 = vshll.u32 %v703_v13, %v294_v8  ;;  %v310_v10 = vshrl.u32 %v704_v24, %v295_v28 }
  0x40   :  { %v179_v1 = vadd.s32 %v178_v46, %v168_v23  ;;  %v308_v14 = vor.u32 %v307_v57, %v306_v49  ;;  %vm314_vm13 = vcmp.lt.s32.totalorder %v833_v50, 3  ;;  %vm315_vm14 = vcmp.lt.s32.totalorder %v833_v50, 4 }
  0x41   :  { %v865_v12 = vadd.s32 %v157_v51, %v148_v3  ;;  %v311_v17 = vor.u32 %v310_v10, %v309_v6  ;;  %vm313_vm15 = vcmp.lt.s32.totalorder %v833_v50, 2  ;;  %v320_v19 = vsel %vm312_vm8, %v299_v54, %v302_v56 }
  0x42   :  { %v180_v62 = vadd.s32 %v179_v1, %v170_v27  ;;  %v181_v8 = vmul.u32 %v797_v55, %v836_v58  ;;  %v321_v20 = vsel %vm315_vm14, %v308_v14, 920167782  ;;  %v324_v22 = vsel %vm312_vm8, %v302_v56, %v305_v4 }
  0x43   :  { %vm183_vm0 = vc.u32 %v865_v12, %v854_v38  ;;  %v322_v3 = vsel %vm314_vm13, %v305_v4, %v321_v20  ;;  %v885_v23 = vadd.f32 %v470_v63, %v841_v61  ;;  %v325_v58 = vsel %vm315_vm14, %v311_v17, 1326507024 }
  0x44   :  { %v184_v21 = vadd.s32 1, %v180_v62  ;;  %v323_v55 = vsel %vm313_vm15, %v320_v19, %v322_v3  ;;  %v329_v25 = vand.u32 65535, %v838_v59  ;;  %v330_v26 = vshrl.u32 %v838_v59, 16 }
  0x45   :  { %v326_v30 = vsel %vm314_vm13, %v308_v14, %v325_v58  ;;  %v353_v0 = vand.u32 65535, %v323_v55  ;;  %v354_v31 = vshrl.u32 %v323_v55, 16  ;;  %v296_v61 = vshrl.u32 %v699_v5, %v295_v28 }
  0x46   :  { %v185_v27 = vsel %vm183_vm0, %v184_v21, %v180_v62  ;;  %v327_v63 = vsel %vm313_vm15, %v324_v22, %v326_v30  ;;  %v317_v40 = vsel %vm315_vm14, %v305_v4, 2102212464  ;;  %v475_v41 = vand.u32 2139095040, %v885_v23 }
  0x47   :  { %v186_v32 = vadd.s32 %v185_v27, %v181_v8  ;;  %v331_v15 = vand.u32 65535, %v327_v63  ;;  %v332_v34 = vshrl.u32 %v327_v63, 16  ;;  %v898_v35 = vmul.u32 %v354_v31, %v329_v25 }
  0x48   :  { %v903_v47 = vmul.u32 %v353_v0, %v330_v26  ;;  %v316_v28 = vsel %vm312_vm8, %v296_v61, %v299_v54  ;;  %v355_v49 = vmul.u32 %v353_v0, %v329_v25  ;;  %v318_v57 = vsel %vm314_vm13, %v302_v56, %v317_v40 }
  0x49   :  { %v187_v36 = vadd.s32 536870912, %v186_v32  ;;  %v333_v44 = vmul.u32 %v331_v15, %v329_v25  ;;  %v334_v45 = vmul.u32 %v332_v34, %v329_v25  ;;  %v335_v46 = vmul.u32 %v331_v15, %v330_v26 }
  0x4a   :  { %v359_v51 = vshll.u32 %v898_v35, 16  ;;  %v336_v1 = vmul.u32 %v332_v34, %v330_v26  ;;  %v358_v14 = vmul.u32 %v354_v31, %v330_v26  ;;  %v360_v62 = vshrl.u32 %v898_v35, 16 }
  0x4b   :  { %v905_v48 = vshrl.u32 %v187_v36, 30  ;;  %v337_v4 = vshll.u32 %v334_v45, 16  ;;  %v339_v6 = vshll.u32 %v335_v46, 16  ;;  %v476_v17 = vshrl.u32 %v475_v41, 23 }
  0x4c   :  { %v338_v54 = vshrl.u32 %v334_v45, 16  ;;  %v361_v8 = vshll.u32 %v903_v47, 16  ;;  %v264_v21 = vsub.f32 0.0, %v752_v16  ;;  %vm363_vm2 = vc.u32 %v355_v49, %v359_v51 }
  0x4d   :  { %v189_v10 = vshll.u32 %v905_v48, 30  ;;  %vm341_vm1 = vc.u32 %v333_v44, %v337_v4  ;;  %v343_v19 = vadd.s32 %v337_v4, %v333_v44  ;;  %v262_v3 = vstv %s759_s24 }
  0x4e   :  { %v342_v56 = vsel %vm341_vm1, 1, %v705_v29  ;;  %v340_v22 = vshrl.u32 %v335_v46, 16  ;;  %v263_v25 = vmul.f32 %v262_v3, %v754_v18  ;;  %v265_v26 = vmul.f32 %v264_v21, %v256_v33 }
  0x4f   :  { %v190_v20 = vsub.s32 %v186_v32, %v189_v10  ;;  %v344_v55 = vadd.s32 %v342_v56, %v336_v1  ;;  %vm345_vm3 = vc.u32 %v343_v19, %v339_v6  ;;  %v364_v30 = vsel %vm363_vm2, 1, %v705_v29 }
  0x50   :  { %v346_v27 = vsel %vm345_vm3, 1, %v705_v29  ;;  %v365_v0 = vadd.s32 %v359_v51, %v355_v49  ;;  %v667_v31 = vadd.s32 4294967169, %v476_v17  ;;  %v266_v61 = vadd.f32 %v265_v26, %v263_v25 }
  0x51   :  { %vm191_vm4 = vcmp.lt.s32.totalorder %v190_v20, 0  ;;  %v192_v58 = vsub.s32 0, %v190_v20  ;;  %v348_v63 = vadd.s32 %v346_v27, %v344_v55  ;;  %v366_v15 = vadd.s32 %v364_v30, %v358_v14 }
  0x52   :  { %v267_v35 = vstv %s907_s6  ;;  %v270_v36 = vstv %s912_s7  ;;  %vm367_vm5 = vc.u32 %v365_v0, %v361_v8  ;;  %v182_v45 = vadd.s32 %v854_v38, %v865_v12 }
  0x53   :  { %v193_v32 = vsel %vm191_vm4, %v192_v58, %v190_v20  ;;  %v268_v40 = vmul.f32 %v267_v35, %v783_v43  ;;  %v271_v41 = vmul.f32 %v270_v36, %v266_v61  ;;  %v349_v44 = vadd.s32 %v348_v63, %v338_v54 }
  0x54   :  { %v194_v34 = vclz %v193_v32  ;;  %v368_v33 = vsel %vm367_vm5, 1, %v705_v29  ;;  %v319_v49 = vsel %vm313_vm15, %v316_v28, %v318_v57  ;;  %v362_v6 = vshrl.u32 %v903_v47, 16 }
  0x55   :  { %v370_v51 = vadd.s32 %v368_v33, %v366_v15  ;;  %v269_v1 = vmul.f32 %v268_v40, %v783_v43  ;;  %v272_v4 = vmul.f32 %v271_v41, %v266_v61  ;;  %v937_v10 = vadd.s32 %v365_v0, %v361_v8 }
  0x56   :  { %v650_v46 = vadd.s32 4294967294, %v194_v34  ;;  %v939_v14 = vadd.s32 %v349_v44, %v340_v22  ;;  %v482_v54 = vadd.s32 1, %v667_v31  ;;  %v373_v57 = vmul.u32 %v838_v59, %v319_v49 }
  0x57   :  { %v371_v17 = vadd.s32 %v370_v51, %v360_v62  ;;  %v941_v21 = vadd.f32 %v272_v4, %v269_v1  ;;  %v472_v59 = vand.u32 2147483647, %v885_v23  ;;  %v456_v0 = vsub.f32 1.0, %v752_v16 }
  0x58   :  { %vm651_vm6 = vcmp.lt.s32.totalorder %v650_v46, 0  ;;  %vm375_vm7 = vc.u32 %v939_v14, %v937_v10  ;;  %vm483_vm8 = vcmp.gt.s32.totalorder %v482_v54, 0  ;;  %v454_v32 = vstv %s777_s30 }
  0x59   :  { %v197_v19 = vsel %vm651_vm6, 0, %v650_v46  ;;  %v372_v28 = vadd.s32 %v371_v17, %v362_v6  ;;  %v484_v8 = vsel %vm483_vm8, %v482_v54, 0  ;;  %v455_v15 = vmul.f32 %v454_v32, %v754_v18 }
  0x5a   :  { %v198_v38 = vsub.s32 32, %v197_v19  ;;  %v199_v12 = vshll.u32 %v190_v20, %v197_v19  ;;  %v202_v50 = vsub.s32 4294967266, %v197_v19  ;;  %v486_v20 = vand.u32 31, %v484_v8 }
  0x5b   :  { %v376_v47 = vadd.s32 1, %v372_v28  ;;  %v457_v34 = vmul.f32 %v456_v0, %v448_v52  ;;  %v479_v35 = vand.u32 8388607, %v472_v59  ;;  %v959_v40 = vshrl.u32 %v484_v8, 5 }
  0x5c   :  { %v200_v43 = vshrl.u32 %v182_v45, %v198_v38  ;;  %v203_v56 = vadd.s32 127, %v202_v50  ;;  %v950_v31 = vsub.s32 32, %v486_v20  ;;  %v498_v41 = vshll.u32 %v702_v11, %v486_v20 }
  0x5d   :  { %v377_v22 = vsel %vm375_vm7, %v376_v47, %v372_v28  ;;  %v964_v44 = vadd.f32 %v457_v34, %v455_v15  ;;  %v489_v33 = vshll.u32 %v699_v5, %v486_v20  ;;  %v492_v52 = vshll.u32 %v700_v7, %v486_v20 }
  0x5e   :  { %v201_v62 = vor.u32 %v200_v43, %v199_v12  ;;  %v204_v3 = vshll.u32 %v203_v56, 23  ;;  %v378_v58 = vadd.s32 %v377_v22, %v373_v57  ;;  %v499_v16 = vshrl.u32 %v703_v13, %v950_v31 }
  0x5f   :  { %v490_v18 = vshrl.u32 %v700_v7, %v950_v31  ;;  %v493_v49 = vshrl.u32 %v701_v9, %v950_v31  ;;  %vm90_vm10 = vcmp.lt.s32.totalorder %v774_v37, 0  ;;  %v495_v51 = vshll.u32 %v701_v9, %v486_v20 }
  0x60   :  { %v205_v55 = vor.u32 4788187, %v204_v3  ;;  %v208_v26 = vcvt.s32.f32 %v201_v62  ;;  %v379_v27 = vadd.s32 536870912, %v378_v58  ;;  %v496_v1 = vshrl.u32 %v702_v11, %v950_v31 }
  0x61   :  { %vm978_vm11 = vcmp.le.f32.partialorder %v88_v39, 0.7853982  ;;  %v500_v6 = vor.u32 %v499_v16, %v498_v41  ;;  %v480_v54 = vor.u32 8388608, %v479_v35  ;;  %v982_v19 = vor.u32 %v490_v18, %v489_v33 }
  0x62   :  { %v206_v25 = vand.u32 2147483647, %v205_v55  ;;  %v947_v30 = vshrl.u32 %v379_v27, 30  ;;  %vm507_vm12 = vcmp.lt.s32.totalorder %v959_v40, 4  ;;  %v987_v38 = vor.u32 %v493_v49, %v492_v52 }
  0x63   :  { %v501_v11 = vshll.u32 %v703_v13, %v486_v20  ;;  %v502_v39 = vshrl.u32 %v704_v24, %v950_v31  ;;  %v992_v50 = vor.u32 %v496_v1, %v495_v51  ;;  %vm504_vm13 = vcmp.lt.s32.totalorder %v959_v40, 1 }
  0x64   :  { %v209_v61 = vmul.f32 %v208_v26, %v206_v25  ;;  %v381_v63 = vshll.u32 %v947_v30, 30  ;;  %vm506_vm14 = vcmp.lt.s32.totalorder %v959_v40, 3  ;;  %v513_v28 = vsel %vm507_vm12, %v500_v6, 920167782 }
  0x65   :  { %v374_v13 = vadd.s32 %v937_v10, %v939_v14  ;;  %v1005_v24 = vshll.u32 %v480_v54, 8  ;;  %v503_v56 = vor.u32 %v502_v39, %v501_v11  ;;  %vm505_vm0 = vcmp.lt.s32.totalorder %v959_v40, 2 }
  0x66   :  { %v382_v36 = vsub.s32 %v378_v58, %v381_v63  ;;  %v210_v45 = vxor.u32 2147483648, %v209_v61  ;;  %v512_v47 = vsel %vm504_vm13, %v982_v19, %v987_v38  ;;  %v514_v22 = vsel %vm506_vm14, %v992_v50, %v513_v28 }
  0x67   :  { %v516_v55 = vsel %vm504_vm13, %v987_v38, %v992_v50  ;;  %v515_v20 = vsel %vm505_vm0, %v512_v47, %v514_v22  ;;  %v517_v25 = vsel %vm507_vm12, %v503_v56, 1326507024  ;;  %v521_v32 = vand.u32 65535, %v1005_v24 }
  0x68   :  { %vm383_vm9 = vcmp.lt.s32.totalorder %v382_v36, 0  ;;  %v384_v46 = vsub.s32 0, %v382_v36  ;;  %v211_v9 = vsel %vm90_vm10, %v210_v45, %v209_v61  ;;  %v518_v0 = vsel %vm506_vm14, %v500_v6, %v517_v25 }
  0x69   :  { %v1001_v57 = vsel %vm978_vm11, %v774_v37, %v211_v9  ;;  %v519_v61 = vsel %vm505_vm0, %v516_v55, %v518_v0  ;;  %v522_v63 = vshrl.u32 %v1005_v24, 16  ;;  %v545_v33 = vand.u32 65535, %v515_v20 }
  0x6a   :  { %v385_v7 = vsel %vm383_vm9, %v384_v46, %v382_v36  ;;  %v1021_v58 = vmul.f32 %v1001_v57, %v1001_v57  ;;  %v523_v35 = vand.u32 65535, %v519_v61  ;;  %v546_v18 = vshrl.u32 %v515_v20, 16 }
  0x6b   :  { %v386_v17 = vclz %v385_v7  ;;  %v212_v51 = vsub.s32 4, %v905_v48  ;;  %vm1038_vm1 = vcmp.le.f32.partialorder %v280_v60, 0.7853982  ;;  %vm282_vm2 = vcmp.lt.s32.totalorder %v795_v53, 0 }
  0x6c   :  { %v217_v41 = vmul.f32 -0.001358992, %v1021_v58  ;;  %v224_v16 = vmul.f32 -0.00019511016, %v1021_v58  ;;  %v525_v45 = vmul.u32 %v523_v35, %v521_v32  ;;  %v527_v49 = vmul.u32 %v523_v35, %v522_v63 }
  0x6d   :  { %v659_v12 = vadd.s32 4294967294, %v386_v17  ;;  %v548_v7 = vmul.u32 %v546_v18, %v521_v32  ;;  %v488_v17 = vshrl.u32 %v699_v5, %v950_v31  ;;  %v549_v28 = vmul.u32 %v545_v33, %v522_v63 }
  0x6e   :  { %v218_v11 = vadd.f32 0.041655596, %v217_v41  ;;  %v531_v39 = vshll.u32 %v527_v49, 16  ;;  %v532_v0 = vshrl.u32 %v527_v49, 16 }
  0x6f   :  { %vm660_vm15 = vcmp.lt.s32.totalorder %v659_v12, 0  ;;  %v553_v5 = vshll.u32 %v549_v28, 16 }
  0x70   :  { %v389_v43 = vsel %vm660_vm15, 0, %v659_v12  ;;  %v547_v12 = vmul.u32 %v545_v33, %v521_v32  ;;  %v219_v35 = vmul.f32 %v218_v11, %v1021_v58  ;;  %vm231_vm15 = vweird.f32 %v774_v37 }
  0x71   :  { %v390_v8 = vsub.s32 32, %v389_v43  ;;  %v391_v62 = vshll.u32 %v382_v36, %v389_v43  ;;  %v394_v3 = vsub.s32 4294967266, %v389_v43  ;;  %v524_v36 = vshrl.u32 %v519_v61, 16 }
  0x73   :  { %v392_v10 = vshrl.u32 %v374_v13, %v390_v8  ;;  %v395_v14 = vadd.s32 127, %v394_v3  ;;  %v526_v46 = vmul.u32 %v524_v36, %v521_v32  ;;  %v528_v54 = vmul.u32 %v524_v36, %v522_v63 }
  0x74   :  { %v225_v13 = vadd.f32 0.008332121, %v224_v16  ;;  %v550_v8 = vmul.u32 %v546_v18, %v522_v63  ;;  %v552_v32 = vshrl.u32 %v548_v7, 16  ;;  %v554_v18 = vshrl.u32 %v549_v28, 16 }
  0x75   :  { %v393_v26 = vor.u32 %v392_v10, %v391_v62  ;;  %v396_v27 = vshll.u32 %v395_v14, 23  ;;  %v529_v9 = vshll.u32 %v526_v46, 16  ;;  %v530_v56 = vshrl.u32 %v526_v46, 16 }
  0x76   :  { %v551_v62 = vshll.u32 %v548_v7, 16  ;;  %v509_v10 = vsel %vm507_vm12, %v992_v50, 2102212464  ;;  %v508_v50 = vsel %vm504_vm13, %v488_v17, %v982_v19 }
  0x77   :  { %v397_v15 = vor.u32 4788187, %v396_v27  ;;  %v400_v34 = vcvt.s32.f32 %v393_v26  ;;  %vm533_vm3 = vc.u32 %v525_v45, %v529_v9  ;;  %v535_v60 = vadd.s32 %v529_v9, %v525_v45 }
  0x78   :  { %v534_v47 = vsel %vm533_vm3, 1, %v705_v29  ;;  %vm555_vm5 = vc.u32 %v547_v12, %v551_v62  ;;  %v557_v26 = vadd.s32 %v551_v62, %v547_v12  ;;  %v226_v27 = vmul.f32 %v225_v13, %v1021_v58 }
  0x79   :  { %v398_v52 = vand.u32 2147483647, %v397_v15  ;;  %v536_v22 = vadd.s32 %v534_v47, %v528_v54  ;;  %vm537_vm4 = vc.u32 %v535_v60, %v531_v39  ;;  %v556_v25 = vsel %vm555_vm5, 1, %v705_v29 }
  0x7a   :  { %v538_v14 = vsel %vm537_vm4, 1, %v705_v29  ;;  %v558_v61 = vadd.s32 %v556_v25, %v550_v8  ;;  %vm559_vm6 = vc.u32 %v557_v26, %v553_v5  ;;  %v510_v36 = vsel %vm506_vm14, %v987_v38, %v509_v10 }
  0x7b   :  { %v401_v6 = vmul.f32 %v400_v34, %v398_v52  ;;  %v540_v20 = vadd.s32 %v538_v14, %v536_v22  ;;  %v560_v41 = vsel %vm559_vm6, 1, %v705_v29  ;;  %v227_v45 = vadd.f32 -0.16666654, %v226_v27 }
  0x7c   :  { %v562_v52 = vadd.s32 %v560_v41, %v558_v61  ;;  %v1067_v49 = vadd.s32 %v557_v26, %v553_v5  ;;  %v511_v19 = vsel %vm505_vm0, %v508_v50, %v510_v36  ;;  %v213_v38 = vsel %vm90_vm10, %v212_v51, %v905_v48 }
  0x7d   :  { %v402_v43 = vxor.u32 2147483648, %v401_v6  ;;  %v541_v34 = vadd.s32 %v540_v20, %v530_v56  ;;  %v220_v29 = vadd.f32 -0.4999988, %v219_v35  ;;  %v404_v54 = vsub.s32 4, %v947_v30 }
  0x7e   :  { %v563_v17 = vadd.s32 %v562_v52, %v552_v32  ;;  %v228_v39 = vmul.f32 %v227_v45, %v1021_v58  ;;  %v565_v28 = vmul.u32 %v1005_v24, %v511_v19  ;;  %v274_v26 = vmul.f32 1.442695, %v941_v21 }
  0x7f   :  { %v403_v3 = vsel %vm282_vm2, %v402_v43, %v401_v6  ;;  %v1065_v46 = vadd.s32 %v541_v34, %v532_v0  ;;  %v215_v43 = vsel %vm978_vm11, 0, %v213_v38  ;;  %v221_v48 = vmul.f32 %v220_v29, %v1021_v58 }
  0x80   :  { %v406_v31 = vsel %vm1038_vm1, %v795_v53, %v403_v3  ;;  %v564_v11 = vadd.s32 %v563_v17, %v554_v18  ;;  %v405_v51 = vsel %vm282_vm2, %v404_v54, %v947_v30  ;;  %v229_v56 = vadd.f32 1.0, %v228_v39 }
  0x81   :  { %v408_v55 = vmul.f32 %v406_v31, %v406_v31  ;;  %vm567_vm7 = vc.u32 %v1065_v46, %v1067_v49  ;;  %v407_v24 = vsel %vm1038_vm1, 0, %v405_v51  ;;  %v222_v22 = vadd.f32 1.0, %v221_v48 }
  0x82   :  { %v568_v13 = vadd.s32 1, %v564_v11  ;;  %v232_v5 = vand.u32 3, %v215_v43  ;;  %v230_v4 = vmul.f32 %v229_v56, %v1001_v57  ;;  %v424_v20 = vand.u32 3, %v407_v24 }
  0x83   :  { %v409_v63 = vmul.f32 -0.001358992, %v408_v55  ;;  %v416_v15 = vmul.f32 -0.00019511016, %v408_v55  ;;  %v82_v30 = vmul.f32 1.442695, %v781_v42  ;;  %vm423_vm0 = vweird.f32 %v795_v53 }
  0x84   :  { %v569_v60 = vsel %vm567_vm7, %v568_v13, %v564_v11  ;;  %vm237_vm8 = vcmp.eq.s32.totalorder %v232_v5, 2  ;;  %v235_v1 = vxor.u32 2147483648, %v230_v4  ;;  %vm234_vm9 = vcmp.eq.s32.totalorder %v232_v5, 0 }
  0x85   :  { %v410_v16 = vadd.f32 0.041655596, %v409_v63  ;;  %v417_v33 = vadd.f32 0.008332121, %v416_v15  ;;  %v570_v62 = vadd.s32 %v569_v60, %v565_v28  ;;  %vm426_vm10 = vcmp.eq.s32.totalorder %v424_v20, 0 }
  0x86   :  { %vm429_vm11 = vcmp.eq.s32.totalorder %v424_v20, 2  ;;  %678 = vpow2.f32 %v82_v30  ;;  %vm233_vm13 = vcmp.lt.s32.totalorder %v232_v5, 2  ;;  %vm425_vm14 = vcmp.lt.s32.totalorder %v424_v20, 2 }
  0x87   :  { %v411_v7 = vmul.f32 %v410_v16, %v408_v55  ;;  %v418_v6 = vmul.f32 %v417_v33, %v408_v55  ;;  %v571_v3 = vadd.s32 536870912, %v570_v62  ;;  %680 = vpow2.f32 %v274_v26 }
  0x88   :  { %v236_v42 = vsel %vm234_vm9, %v222_v22, %v235_v1  ;;  %v566_v16 = vadd.s32 %v1067_v49, %v1065_v46  ;;  %vm627_vm2 = vcmask 1040384   ;;  %v459_v49 = vstv %s663_s8 }
  0x89   :  { %v419_v9 = vadd.f32 -0.16666654, %v418_v6  ;;  %v412_v12 = vadd.f32 -0.4999988, %v411_v7  ;;  %v1088_v58 = vshrl.u32 %v571_v3, 30  ;;  %v462_v39 = vstv %s664_s9 }
  0x8a   :  { %vm474_vm3 = vcmp.lt.s32.totalorder %v885_v23, 0  ;;  %v460_v28 = vmul.f32 %v459_v49, %v806_v2  ;;  %vm1102_vm4 = vcmp.le.f32.partialorder %v472_v59, 0.7853982  ;;  %vm629_vm9 = vcmask 1041408  }
  0x8b   :  { %v420_v40 = vmul.f32 %v419_v9, %v408_v55  ;;  %v413_v47 = vmul.f32 %v412_v12, %v408_v55  ;;  %v573_v25 = vshll.u32 %v1088_v58, 30  ;;  %v238_v55 = vxor.u32 2147483648, %v222_v22 }
  0x8c   :  { %v679_v36 = vpop.eup %678  ;;  %v596_v51 = vsub.s32 4, %v1088_v58  ;;  %v461_v56 = vmul.f32 %v460_v28, %v806_v2 }
  0x8d   :  { %v421_v8 = vadd.f32 1.0, %v420_v40  ;;  %v414_v10 = vadd.f32 1.0, %v413_v47  ;;  %v574_v32 = vsub.s32 %v570_v62, %v573_v25  ;;  %v681_v41 = vpop.eup %680  ;;  %v463_v40 = vmul.f32 %v462_v39, %v964_v44 }
  0x8e   :  { %v597_v59 = vsel %vm474_vm3, %v596_v51, %v1088_v58 }
  0x8f   :  { %v422_v14 = vmul.f32 %v421_v8, %v406_v31  ;;  %v430_v0 = vxor.u32 2147483648, %v414_v10  ;;  %vm575_vm12 = vcmp.lt.s32.totalorder %v574_v32, 0  ;;  %v576_v57 = vsub.s32 0, %v574_v32 }
  0x90   :  { %v239_v31 = vsel %vm237_vm8, %v238_v55, %v230_v4  ;;  %v464_v47 = vmul.f32 %v463_v40, %v964_v44  ;;  %v599_v4 = vsel %vm1102_vm4, 0, %v597_v59  ;;  %vm615_vm8 = vweird.f32 %v885_v23 }
  0x91   :  { %v427_v27 = vxor.u32 2147483648, %v422_v14  ;;  %v431_v63 = vsel %vm429_vm11, %v430_v0, %v422_v14  ;;  %v577_v15 = vsel %vm575_vm12, %v576_v57, %v574_v32  ;;  %v240_v21 = vsel %vm233_vm13, %v236_v42, %v239_v31 }
  0x92   :  { %v578_v34 = vclz %v577_v15  ;;  %v241_v33 = vsel %vm231_vm15, nan, %v240_v21  ;;  %v465_v3 = vadd.f32 %v464_v47, %v461_v56  ;;  %v616_v55 = vand.u32 3, %v599_v4 }
  0x93   :  { %v428_v61 = vsel %vm426_vm10, %v414_v10, %v427_v27  ;;  %v242_v37 = vmul.f32 %v679_v36, %v241_v33 }
  0x94   :  { %v432_v35 = vsel %vm425_vm14, %v428_v61, %v431_v63  ;;  %v668_v50 = vadd.s32 4294967294, %v578_v34  ;;  %v466_v20 = vmul.f32 1.442695, %v465_v3  ;;  %vm621_vm5 = vcmp.eq.s32.totalorder %v616_v55, 2 }
  0x95   :  { %v433_v18 = vsel %vm423_vm0, nan, %v432_v35  ;;  %vm618_vm6 = vcmp.eq.s32.totalorder %v616_v55, 0  ;;  %vm617_vm7 = vcmp.lt.s32.totalorder %v616_v55, 2 }
  0x96   :  { %vm669_vm1 = vcmp.lt.s32.totalorder %v668_v50, 0  ;;  %v434_v19 = vmul.f32 %v681_v41, %v433_v18  ;;  %682 = vpow2.f32 %v466_v20 }
  0x97   :  { %v581_v52 = vsel %vm669_vm1, 0, %v668_v50 }
  0x98   :  { %v582_v45 = vsub.s32 32, %v581_v52  ;;  %v583_v7 = vshll.u32 %v574_v32, %v581_v52  ;;  %v586_v6 = vsub.s32 4294967266, %v581_v52  ;;  %v628_v11 = vsel %vm627_vm2, %v242_v37, %v434_v19 }
  0x9a   :  { %v584_v17 = vshrl.u32 %v566_v16, %v582_v45  ;;  %v587_v53 = vadd.s32 127, %v586_v6 }
  0x9c   :  { %v585_v38 = vor.u32 %v584_v17, %v583_v7  ;;  %v588_v29 = vshll.u32 %v587_v53, 23  ;;  %v683_v57 = vpop.eup %682 }
  0x9e   :  { %v589_v54 = vor.u32 4788187, %v588_v29  ;;  %v592_v9 = vcvt.s32.f32 %v585_v38 }
  0xa0   :  { %v590_v46 = vand.u32 2147483647, %v589_v54 }
  0xa2   :  { %v593_v12 = vmul.f32 %v592_v9, %v590_v46 }
  0xa4   :  { %v594_v43 = vxor.u32 2147483648, %v593_v12 }
  0xa6   :  { %v595_v48 = vsel %vm474_vm3, %v594_v43, %v593_v12 }
  0xa7   :  { %v598_v60 = vsel %vm1102_vm4, %v885_v23, %v595_v48 }
  0xa8   :  { %v600_v8 = vmul.f32 %v598_v60, %v598_v60 }
  0xaa   :  { %v601_v62 = vmul.f32 -0.001358992, %v600_v8  ;;  %v608_v24 = vmul.f32 -0.00019511016, %v600_v8 }
  0xac   :  { %v602_v22 = vadd.f32 0.041655596, %v601_v62  ;;  %v609_v5 = vadd.f32 0.008332121, %v608_v24 }
  0xae   :  { %v603_v10 = vmul.f32 %v602_v22, %v600_v8  ;;  %v610_v14 = vmul.f32 %v609_v5, %v600_v8 }
  0xb0   :  { %v604_v30 = vadd.f32 -0.4999988, %v603_v10  ;;  %v611_v25 = vadd.f32 -0.16666654, %v610_v14 }
  0xb2   :  { %v605_v2 = vmul.f32 %v604_v30, %v600_v8  ;;  %v612_v26 = vmul.f32 %v611_v25, %v600_v8 }
  0xb4   :  { %v606_v44 = vadd.f32 1.0, %v605_v2  ;;  %v613_v1 = vadd.f32 1.0, %v612_v26 }
  0xb6   :  { %v614_v27 = vmul.f32 %v613_v1, %v598_v60  ;;  %v622_v58 = vxor.u32 2147483648, %v606_v44 }
  0xb8   :  { %v619_v0 = vxor.u32 2147483648, %v614_v27  ;;  %v623_v32 = vsel %vm621_vm5, %v622_v58, %v614_v27 }
  0xba   :  { %v620_v31 = vsel %vm618_vm6, %v606_v44, %v619_v0 }
  0xbb   :  { %v624_v42 = vsel %vm617_vm7, %v620_v31, %v623_v32 }
  0xbc   :  { %v625_v61 = vsel %vm615_vm8, nan, %v624_v42 }
  0xbd   :  { %v626_v63 = vmul.f32 %v683_v57, %v625_v61 }
  0xbf   :  { %v630_v15 = vsel %vm629_vm9, %v628_v11, %v626_v63 }
  0xc0   :  { %631 = vst [vmem:[%s1120_s1] sm:$0x7] %v630_v15 }
  0xc1   :  { %636 = vsyncpa [#allocation3], 1 }

</bundles_post_ra>
